<compile_context>
chip_gen: v7x
topology: tpu7x:2x2x1
jax: 0.10.0
libtpu: 0.0.40
codegen_flags: <defaults>
</compile_context>

<pallas_src>
import jax
import jax.numpy as jnp
import numpy as np
from jax.experimental import pallas as pl
from jax.experimental.pallas import tpu as pltpu

D = 128  # embedding dim (lane axis inside the kernel)


def _cdiv(a, b):
    return (a + b - 1) // b


def _round_up(x, m):
    return ((x + m - 1) // m) * m


def _choose_tiling(n, itemsize, d):
    """Row-tile size, padded length and grid steps for streaming (n, d) slabs."""
    n8 = _round_up(max(n, 1), 8)
    # 2 inputs x 2 pipeline buffers per step; stay under ~8 MiB so v5e's 16 MiB default
    # scoped VMEM has headroom (bf16 -> 8192 rows, f32 -> 4096 rows at D=128).
    budget = 8 * 1024 * 1024
    max_tile = max(8, (budget // (4 * d * itemsize)) // 8 * 8)
    num_steps = _cdiv(n8, max_tile)
    if num_steps == 1 and n8 >= 16:
        num_steps = 2  # >= 2 grid steps so both v7x TensorCores get work
    tile = _round_up(_cdiv(n8, num_steps), 8)  # divides n_pad tightly -> minimal padding
    n_pad = tile * num_steps
    return tile, n_pad, num_steps


def _subsumption_tile_kernel(h_ref, t_ref, r_ref, o_ref):
    # h_ref, t_ref: (TILE, D) streamed rows (bf16 or f32); r_ref: (1, D) f32 resident;
    # o_ref: (TILE, 1) f32.
    h = h_ref[...].astype(jnp.float32)          # upcast before subtract (bf16 cancellation)
    t = t_ref[...].astype(jnp.float32)
    diff = (h - t) + r_ref[...]                  # (TILE, D) VPU:  h + r - t   (r broadcasts)
    d = diff.shape[1]
    ones = jnp.ones((d, 1), jnp.float32)
    # Row-wise sum of squares via MXU (keeps the XLU out of the critical path on v7x).
    ssq = jnp.dot(diff * diff, ones, preferred_element_type=jnp.float32)  # (TILE, 1)
    o_ref[...] = jnp.sqrt(ssq)                   # ||h + r - t||_2


def subsumption_scores(data, node_ids, entity_emb, rel_emb, rel_id):
    """data: int32 [N, 2] class-id pairs.  Returns float32 [N, 1] = -score_hrt."""
    n = int(data.shape[0])
    d = int(entity_emb.shape[1])

    # glue (plain JAX): class-id -> node-id mapping (the module's self.node_ids gather)
    h_nids = node_ids[data[:, 0]]
    t_nids = node_ids[data[:, 1]]
    rel_row = rel_emb[rel_id][None, :].astype(jnp.float32)      # (1, D) 'http://arrow' row

    # Batched pre-gather (efficient XLA gather DMA); rows keep their storage dtype (bf16 ok).
    h_rows = jnp.take(entity_emb, h_nids, axis=0)               # (n, D)
    t_rows = jnp.take(entity_emb, t_nids, axis=0)               # (n, D)

    itemsize = int(jnp.dtype(entity_emb.dtype).itemsize)
    tile, n_pad, num_steps = _choose_tiling(n, itemsize, d)

    if n_pad != n:
        h_rows = jnp.pad(h_rows, ((0, n_pad - n), (0, 0)))
        t_rows = jnp.pad(t_rows, ((0, n_pad - n), (0, 0)))

    cost = pl.CostEstimate(
        flops=5 * n_pad * d,                     # sub + add + mul + 2*D matmul per row
        transcendentals=n_pad,                   # sqrt per row
        bytes_accessed=2 * n_pad * d * itemsize + d * 4 + n_pad * 4,
    )

    out = pl.pallas_call(
        _subsumption_tile_kernel,
        out_shape=jax.ShapeDtypeStruct((n_pad, 1), jnp.float32),
        grid_spec=pltpu.PrefetchScalarGridSpec(
            num_scalar_prefetch=0,
            grid=(num_steps,),
            in_specs=[
                pl.BlockSpec((tile, d), lambda i: (i, 0)),       # head rows for this tile
                pl.BlockSpec((tile, d), lambda i: (i, 0)),       # tail rows for this tile
                pl.BlockSpec((1, d), lambda i: (0, 0)),          # resident relation row
            ],
            out_specs=pl.BlockSpec((tile, 1), lambda i: (i, 0)),
        ),
        compiler_params=pltpu.CompilerParams(dimension_semantics=("parallel",)),
        cost_estimate=cost,
    )(h_rows, t_rows, rel_row)

    return out[:n]                                               # (N, 1), matches score_hrt shape


def _reference_scores(data, node_ids, entity_emb, rel_emb, rel_id):
    h = entity_emb[node_ids[data[:, 0]]].astype(jnp.float32)
    t = entity_emb[node_ids[data[:, 1]]].astype(jnp.float32)
    r = rel_emb[rel_id][None, :].astype(jnp.float32)
    return jnp.linalg.norm(h + r - t, axis=-1, keepdims=True)


if __name__ == "__main__":
    key = jax.random.PRNGKey(0)
    k_ent, k_rel, k_perm, k_data = jax.random.split(key, 4)

    num_nodes = 32        # total graph nodes (entity embedding rows)
    num_relations = 4     # relation embedding rows; 'http://arrow' -> id 1
    num_classes = 16      # GO_* evaluation classes
    n_pairs = 8           # batch of (sub, sup) class-id pairs

    # deterministic synthetic "KGE" parameters (TransE-style); entity table stored bf16.
    entity_emb = (0.1 * jax.random.normal(k_ent, (num_nodes, D), dtype=jnp.float32)
                  ).astype(jnp.bfloat16)
    rel_emb = 0.1 * jax.random.normal(k_rel, (num_relations, D), dtype=jnp.float32)
    rel_id = 1

    # class-id -> node-id table (the module's self.node_ids)
    node_ids = jax.random.permutation(k_perm, num_nodes)[:num_classes].astype(jnp.int32)

    # evaluation data: pairs of class ids
    data = jax.random.randint(k_data, (n_pairs, 2), 0, num_classes, dtype=jnp.int32)

    scores = subsumption_scores(data, node_ids, entity_emb, rel_emb, rel_id)
    scores = jax.block_until_ready(scores)

    ref = _reference_scores(data, node_ids, entity_emb, rel_emb, rel_id)
    assert scores.shape == (n_pairs, 1)
    np.testing.assert_allclose(np.asarray(scores), np.asarray(ref), rtol=1e-5, atol=1e-5)

    print("KERNEL_OK")
</pallas_src>

<mosaic_0001>
module attributes {stable_mosaic.version = 11 : i64} {
  func.func @_subsumption_tile_kernel(%arg0: i32, %arg1: memref<8x128xbf16, #tpu.memory_space<vmem>>, %arg2: memref<8x128xbf16, #tpu.memory_space<vmem>>, %arg3: memref<1x128xf32, #tpu.memory_space<vmem>>, %arg4: memref<8x1xf32, #tpu.memory_space<vmem>>) attributes {dimension_semantics = [#tpu.dimension_semantics<parallel>], iteration_bounds = array<i64: 1>, scalar_prefetch = 0 : i64, scratch_operands = 0 : i64, tpu.core_type = #tpu.core_type<tc>, window_params = [{transform_indices = @transform_0, window_bounds = array<i64: 8, 128>}, {transform_indices = @transform_1, window_bounds = array<i64: 8, 128>}, {pipeline_mode = #tpu.pipeline_mode<synchronous>, transform_indices = @transform_2, window_bounds = array<i64: 1, 128>}, {transform_indices = @transform_3, window_bounds = array<i64: 8, 1>}]} {
    %c0 = arith.constant 0 : index
    %c0_0 = arith.constant 0 : index
    %0 = vector.load %arg1[%c0, %c0_0] : memref<8x128xbf16, #tpu.memory_space<vmem>>, vector<8x128xbf16>
    %1 = arith.extf %0 : vector<8x128xbf16> to vector<8x128xf32>
    %c0_1 = arith.constant 0 : index
    %c0_2 = arith.constant 0 : index
    %2 = vector.load %arg2[%c0_1, %c0_2] : memref<8x128xbf16, #tpu.memory_space<vmem>>, vector<8x128xbf16>
    %3 = arith.extf %2 : vector<8x128xbf16> to vector<8x128xf32>
    %4 = arith.subf %1, %3 : vector<8x128xf32>
    %c0_3 = arith.constant 0 : index
    %c0_4 = arith.constant 0 : index
    %5 = vector.load %arg3[%c0_3, %c0_4] : memref<1x128xf32, #tpu.memory_space<vmem>>, vector<1x128xf32>
    %6 = vector.broadcast %5 : vector<1x128xf32> to vector<8x128xf32>
    %7 = arith.addf %4, %6 : vector<8x128xf32>
    %cst = arith.constant 1.000000e+00 : f32
    %8 = vector.broadcast %cst : f32 to vector<128x1xf32>
    %9 = arith.mulf %7, %7 : vector<8x128xf32>
    %cst_5 = arith.constant dense<0.000000e+00> : vector<8x1xf32>
    %10 = tpu.matmul %9, %8, %cst_5 {dimension_numbers = #tpu.dot_dimension_numbers<[1], [0], [0], [1], [0, 0, 1, 1], [], []>} : vector<8x128xf32>, vector<128x1xf32>, vector<8x1xf32> -> vector<8x1xf32>
    %11 = math.sqrt %10 : vector<8x1xf32>
    %c0_6 = arith.constant 0 : index
    %c0_7 = arith.constant 0 : index
    %12 = vector.load %arg4[%c0_6, %c0_7] : memref<8x1xf32, #tpu.memory_space<vmem>>, vector<8x1xf32>
    tpu.vector_store %arg4[%c0_6, %c0_7], %11 {strides = array<i32>} : memref<8x1xf32, #tpu.memory_space<vmem>>, vector<8x1xf32>,
    return
  }
  func.func @transform_0(%arg0: i32) -> (i32, i32) {
    %c0_i32 = arith.constant 0 : i32
    %c0_i32_0 = arith.constant 0 : i32
    return %arg0, %c0_i32 : i32, i32
  }
  func.func @transform_1(%arg0: i32) -> (i32, i32) {
    %c0_i32 = arith.constant 0 : i32
    %c0_i32_0 = arith.constant 0 : i32
    return %arg0, %c0_i32 : i32, i32
  }
  func.func @transform_2(%arg0: i32) -> (i32, i32) {
    %c0_i32 = arith.constant 0 : i32
    %c0_i32_0 = arith.constant 0 : i32
    %c0_i32_1 = arith.constant 0 : i32
    return %c0_i32, %c0_i32_0 : i32, i32
  }
  func.func @transform_3(%arg0: i32) -> (i32, i32) {
    %c0_i32 = arith.constant 0 : i32
    %c0_i32_0 = arith.constant 0 : i32
    return %arg0, %c0_i32 : i32, i32
  }
}

</mosaic_0001>

<bundles_post_ra>
// kernel: tpu_custom_call.1
= control target key start
LH: loop header
LB: loop body
LE: loop exit
PB: predicated region body
PF: predicated region fallthrough
CT: control target
= control target key end

     0   :  { %8 = vsyncpa [#allocation3], 0  ;;  %s318_s0 = inlined_call_operand.hbm [shape: bf16[8,128], index: 0, kind: input, shape index: {}]   ;;  %s319_s1 = inlined_call_operand.hbm [shape: bf16[8,128], index: 1, kind: input, shape index: {}]   ;;  %s320_s2 = inlined_call_operand.vmem [shape: f32[1,128], index: 2, kind: input, shape index: {}]   ;;  %s321_s3 = inlined_call_operand.vmem [shape: f32[8,1], index: 3, kind: output, shape index: {}]  }
   0x1   :  { %9 = vsyncpa [#allocation5], 0  ;;  %s262_s12 = smov [#allocation2]   ;;  %s263_s14 = smov [#allocation4]  }
   0x2   :  { %s16_s13 = sshll.u32 %s262_s12, 4  ;;  %s26_s15 = sshll.u32 %s263_s14, 4  ;;  %s17_s13 = int_to_ptr.vmem [resolvable:$true] %s16_s13  ;;  %s27_s15 = int_to_ptr.vmem [resolvable:$true] %s26_s15 }
   0x3   :  { %s214_s18 = scalar_lea.hbm %s318_s0, 64 }
   0x4   :  { %p215_p0 = scmp.ne.s32.totalorder %s318_s0, %s214_s18  ;;  %p218_p1 = scmp.lt.u32.totalorder %s214_s18, %s318_s0 }
   0x6   :  { %p220_p2 = pnand %p218_p1, %p215_p0 }
   0x8   :  { %223 = shalt.err (!%p220_p2)
}
   0x9   :  { %s224_s23 = scalar_lea.vmem %s17_s13, 64  ;;  %p229_p4 = scmp.lt.s32.totalorder %s17_s13, %s17_s13 }
   0xa   :  { %p225_p3 = scmp.ne.s32.totalorder %s17_s13, %s224_s23  ;;  %p230_p5 = scmp.lt.s32.totalorder %s224_s23, %s224_s23 }
   0xc   :  { %p231_p6 = por %p230_p5, %p229_p4 }
   0xe   :  { %p232_p7 = pnand %p231_p6, %p225_p3 }
  0x10   :  { %235 = shalt.err (!%p232_p7)
}
  0x11   :  { %19 = dma.hbm_to_vmem [thread:$0]  %s318_s0, 64, %s17_s13, [#allocation3]  }
  0x12   :  { %s236_s28 = scalar_lea.hbm %s319_s1, 64 }
  0x13   :  { %p237_p8 = scmp.ne.s32.totalorder %s319_s1, %s236_s28  ;;  %p240_p9 = scmp.lt.u32.totalorder %s236_s28, %s319_s1 }
  0x15   :  { %p242_p10 = pnand %p240_p9, %p237_p8 }
  0x17   :  { %245 = shalt.err (!%p242_p10)
}
  0x18   :  { %s246_s6 = scalar_lea.vmem %s27_s15, 64  ;;  %p251_p12 = scmp.lt.s32.totalorder %s27_s15, %s27_s15 }
  0x19   :  { %p247_p11 = scmp.ne.s32.totalorder %s27_s15, %s246_s6  ;;  %p252_p13 = scmp.lt.s32.totalorder %s246_s6, %s246_s6 }
  0x1b   :  { %p253_p0 = por %p252_p13, %p251_p12 }
  0x1d   :  { %p254_p1 = pnand %p253_p0, %p247_p11 }
  0x1f   :  { %257 = shalt.err (!%p254_p1)
}
  0x20   :  { %29 = dma.hbm_to_vmem [thread:$0]  %s319_s1, 64, %s27_s15, [#allocation5]  }
  0x21   :  { %258 = dma.done.wait [#allocation3], 64  }
  0x22   :  { %259 = vsyncadd [#allocation3], 4294967232 }
  0x23   :  { %260 = dma.done.wait [#allocation5], 64  }
  0x24   :  { %261 = vsyncadd [#allocation5], 4294967232  ;;  %v264_v0 = vmov 0.0|0.0   ;;  %v265_v1 = vmov 1.0|1.0   ;;  %vm266_vm0 = vmmov 0  }
  0x25   :  { %190 = vmatprep.subr.bf16.mxu0 %v264_v0  ;;  %v267_v2 = vmov 0.0   ;;  %v38_v3 = vld [vmem:[#allocation2] sm:$0xf]  ;;  %v40_v4 = vld [vmem:[#allocation4] sm:$0xf]  ;;  %vm129_vm2 = vcmask 7168  }
  0x26   :  { %191 = vmatpush3.bf16.msra.mxu0 %v265_v1  ;;  %187 = vmatprep.mubr.msk.f32.mxu0 %vm266_vm0, %v267_v2  ;;  %v39_v5 = vunpack.c.l.bf16 %v38_v3  ;;  %v41_v6 = vunpack.c.l.bf16 %v40_v4  ;;  %v137_v8 = vld [vmem:[%s320_s2] ss:$0 sm:$0xff] }
  0x27   :  { %192 = vmatprep.subr.bf16.mxu0 %v264_v0 }
  0x28   :  { %v42_v7 = vsub.f32 %v39_v5, %v41_v6 }
  0x2a   :  { %193 = vmatpush3.bf16.msra.mxu0 %v265_v1  ;;  %v50_v9 = vadd.f32 %v137_v8, %v42_v7 }
  0x2b   :  { %194 = vmatprep.subr.bf16.mxu0 %v264_v0 }
  0x2c   :  { %v51_v10 = vmul.f32 %v50_v9, %v50_v9 }
  0x2e   :  { %195 = vmatpush3.bf16.msra.mxu0 %v265_v1 }
  0x2f   :  { %196 = vmatprep.subr.bf16.mxu0 %v264_v0 }
  0x32   :  { %197 = vmatpush3.bf16.msra.mxu0 %v265_v1 }
  0x33   :  { %198 = vmatprep.subr.bf16.mxu0 %v264_v0 }
  0x36   :  { %199 = vmatpush3.bf16.msra.mxu0 %v265_v1 }
  0x37   :  { %200 = vmatprep.subr.bf16.mxu0 %v264_v0 }
  0x3a   :  { %201 = vmatpush3.bf16.msra.mxu0 %v265_v1 }
  0x3b   :  { %202 = vmatprep.subr.bf16.mxu0 %v264_v0 }
  0x3e   :  { %203 = vmatpush3.bf16.msra.mxu0 %v265_v1 }
  0x3f   :  { %204 = vmatprep.subr.bf16.mxu0 %v264_v0 }
  0x42   :  { %205 = vmatpush3.bf16.msra.mxu0 %v265_v1 }
  0x45   :  { %188 = vmatmul.mubr.f32.vlgmr.msra.gmra.mrb[0].mxu0 %v51_v10 }
 0x118   :  { %v118_v11 = vpop.f32.mrb[0].mxu0 }
 0x119   :  { %212 = vrsqrt.f32 %v118_v11  ;;  %v189_v12 = vpop.f32.mrb[1].mxu0  ;;  %vm124_vm1 = vcmp.eq.f32.partialorder %v118_v11, inf  ;;  %v127_v15 = vand.u32 2147483648, %v118_v11  ;;  %vm126_vm3 = vcmp.eq.f32.partialorder %v118_v11, 0.0 }
 0x123   :  { %v213_v13 = vpop.eup %212 }
 0x124   :  { %v123_v14 = vmul.f32 %v213_v13, %v118_v11 }
 0x126   :  { %v125_v16 = vsel %vm124_vm1, %v118_v11, %v123_v14 }
 0x127   :  { %v128_v17 = vsel %vm126_vm3, %v127_v15, %v125_v16 }
 0x128   :  { %130 = vst.msk [vmem:[%s321_s3] sm:$0xff] %vm129_vm2, %v128_v17 }
 0x129   :  { %135 = vsyncpa [#allocation3], 1 }
 0x12a   :  { %136 = vsyncpa [#allocation5], 1 }

</bundles_post_ra>
